<compile_context>
chip_gen: v6e
topology: v6e:2x2x1
jax: 0.10.0
libtpu: 0.0.40
codegen_flags: <defaults>
</compile_context>

<pallas_src>
import math

import jax
import jax.numpy as jnp
from jax import lax
from jax.experimental import pallas as pl
from jax.experimental.pallas import tpu as pltpu


# ------------------------------ fused kernel --------------------------------

def _attn_head_kernel(x_ref, ctx_ref, wq_ref, wk_ref, wv_ref, wout_ref,
                      o_ref, acc_ref):
    """Grid step = (batch b, query tile qi, head h); head axis is a reduction.

    x_ref:    (1, tq, Cq)  bf16 query tokens
    ctx_ref:  (1, M, Cc)   bf16 context tokens
    wq_ref:   (1, Cq, D)   bf16 per-head query proj (softmax scale pre-folded)
    wk_ref:   (1, Cc, D)   bf16 per-head key proj
    wv_ref:   (1, Cc, D)   bf16 per-head value proj
    wout_ref: (1, D, Cq)   bf16 per-head slice of the output proj
    o_ref:    (1, tq, Cq)  output (x dtype)
    acc_ref:  (tq, Cq)     f32 VMEM accumulator across heads
    """
    h = pl.program_id(2)

    @pl.when(h == 0)
    def _():
        acc_ref[...] = jnp.zeros_like(acc_ref)

    x = x_ref[0]        # (tq, Cq) bf16
    ctx = ctx_ref[0]    # (M, Cc)  bf16

    # Per-head projections on the MXU (bf16 operands, f32 accumulate).
    q = jnp.dot(x, wq_ref[0], preferred_element_type=jnp.float32)      # (tq, D)
    k = jnp.dot(ctx, wk_ref[0], preferred_element_type=jnp.float32)    # (M, D)
    v = jnp.dot(ctx, wv_ref[0], preferred_element_type=jnp.float32)    # (M, D)

    # Scores: contract the trailing dims directly (no k.T relayout on the XLU).
    s = lax.dot_general(q.astype(jnp.bfloat16), k.astype(jnp.bfloat16),
                        (((1,), (1,)), ((), ())),
                        preferred_element_type=jnp.float32)             # (tq, M)

    # Softmax statistics in f32; denominator deferred to the small (tq, D) tile.
    m = jnp.max(s, axis=-1, keepdims=True)
    p = jnp.exp(s - m)
    l = jnp.sum(p, axis=-1, keepdims=True)

    pv = jnp.dot(p.astype(jnp.bfloat16), v.astype(jnp.bfloat16),
                 preferred_element_type=jnp.float32)                    # (tq, D)
    pv = pv * pl.reciprocal(l, approx=True)                             # EUP slot

    # Accumulate this head's contribution to the output projection.
    acc_ref[...] += jnp.dot(pv.astype(jnp.bfloat16), wout_ref[0],
                            preferred_element_type=jnp.float32)         # (tq, Cq)

    @pl.when(h == pl.num_programs(2) - 1)
    def _():
        o_ref[0] = acc_ref[...].astype(o_ref.dtype)


# -------------------------------- wrapper ------------------------------------

def linear_cross_attention(x, context, params, heads, *, tq=None):
    """Forward pass of xformers_LinearCrossAttention (single fused launch).

    x:       (B, N, query_dim)
    context: (B, M, context_dim) or None (-> self attention on x)
    params:  dict with wq (query_dim, inner), wk/wv (context_dim, inner),
             wout (inner, query_dim)   [already transposed vs torch Linear]
    """
    if context is None:
        context = x
    B, N, Cq = x.shape
    M, Cc = context.shape[1], context.shape[2]
    inner = params["wq"].shape[1]
    assert inner % heads == 0, "inner_dim must be divisible by heads"
    D = inner // heads
    assert params["wk"].shape[0] == Cc and params["wv"].shape[0] == Cc, (
        "context_dim mismatch between `context` and wk/wv (self-attention path "
        "requires query_dim == context_dim)")
    scale = 1.0 / math.sqrt(D)

    # Query tiling: full N at small scale, 128-row tiles at production scale.
    if tq is None:
        tq = N if N <= 128 else 128
    assert N % tq == 0, "N must be divisible by the query tile size"

    # bf16 MXU operands (f32 accumulation inside the kernel).
    x_b = x.astype(jnp.bfloat16)
    ctx_b = context.astype(jnp.bfloat16)
    # Split the per-head lane slices host-side (free, done once by XLA):
    #   (C, H*D) -> (H, C, D);  (H*D, Cq) -> (H, D, Cq).
    # Softmax scale folded into wq.
    wq_r = (params["wq"] * scale).reshape(Cq, heads, D).transpose(1, 0, 2)
    wq_r = wq_r.astype(jnp.bfloat16)
    wk_r = params["wk"].reshape(Cc, heads, D).transpose(1, 0, 2).astype(jnp.bfloat16)
    wv_r = params["wv"].reshape(Cc, heads, D).transpose(1, 0, 2).astype(jnp.bfloat16)
    wout_r = params["wout"].reshape(heads, D, Cq).astype(jnp.bfloat16)

    grid = (B, N // tq, heads)

    out = pl.pallas_call(
        _attn_head_kernel,
        out_shape=jax.ShapeDtypeStruct((B, N, Cq), x.dtype),
        grid=grid,
        in_specs=[
            # x tile: constant across the head axis -> stays VMEM-resident.
            pl.BlockSpec((1, tq, Cq), lambda b, qi, h: (b, qi, 0)),
            # context: constant across qi and h within a batch.
            pl.BlockSpec((1, M, Cc), lambda b, qi, h: (b, 0, 0)),
            # per-head weight slices selected by the head grid index (DMA offset,
            # no in-kernel lane slicing).
            pl.BlockSpec((1, Cq, D), lambda b, qi, h: (h, 0, 0)),
            pl.BlockSpec((1, Cc, D), lambda b, qi, h: (h, 0, 0)),
            pl.BlockSpec((1, Cc, D), lambda b, qi, h: (h, 0, 0)),
            pl.BlockSpec((1, D, Cq), lambda b, qi, h: (h, 0, 0)),
        ],
        # Output block constant across the head (reduction) axis -> accumulator.
        out_specs=pl.BlockSpec((1, tq, Cq), lambda b, qi, h: (b, qi, 0)),
        scratch_shapes=[pltpu.VMEM((tq, Cq), jnp.float32)],
        compiler_params=pltpu.CompilerParams(
            # B and the q-tile axis shard across v7x's 2 TCs (finer than whole
            # batches); heads is the output-resident reduction axis (last).
            dimension_semantics=("parallel", "parallel", "arbitrary"),
            # Explicit budget: fits v7x's 64 MiB physical / 32 MiB scoped VMEM.
            vmem_limit_bytes=32 * 1024 * 1024,
        ),
    )(x_b, ctx_b, wq_r, wk_r, wv_r, wout_r)
    return out


# ------------------------------ reference -----------------------------------

def reference_forward(x, context, params, heads):
    if context is None:
        context = x
    B, N, _ = x.shape
    M = context.shape[1]
    inner = params["wq"].shape[1]
    D = inner // heads
    q = (x @ params["wq"]).reshape(B, N, heads, D)
    k = (context @ params["wk"]).reshape(B, M, heads, D)
    v = (context @ params["wv"]).reshape(B, M, heads, D)
    scale = 1.0 / math.sqrt(D)
    s = jnp.einsum("bnhd,bmhd->bhnm", q, k) * scale
    p = jax.nn.softmax(s, axis=-1)
    o = jnp.einsum("bhnm,bmhd->bnhd", p, v).reshape(B, N, inner)
    return o @ params["wout"]


# -------------------------------- main ---------------------------------------

if __name__ == "__main__":
    # Small shapes consistent with the module
    B, N, M = 2, 16, 8            # N = h*w query tokens, M = context tokens
    query_dim, context_dim = 32, 48
    heads, dim_head = 2, 16
    inner = heads * dim_head

    key = jax.random.PRNGKey(0)
    kx, kc, k1, k2, k3, k4 = jax.random.split(key, 6)

    x = jax.random.normal(kx, (B, N, query_dim), dtype=jnp.float32)
    context = jax.random.normal(kc, (B, M, context_dim), dtype=jnp.float32)

    # deterministic weights; stored as (in, out) == torch Linear weight^T
    params = {
        "wq":   0.05 * jax.random.normal(k1, (query_dim, inner), jnp.float32),
        "wk":   0.05 * jax.random.normal(k2, (context_dim, inner), jnp.float32),
        "wv":   0.05 * jax.random.normal(k3, (context_dim, inner), jnp.float32),
        "wout": 0.05 * jax.random.normal(k4, (inner, query_dim), jnp.float32),
    }

    out = linear_cross_attention(x, context, params, heads)
    out = jax.block_until_ready(out)

    ref = reference_forward(x, context, params, heads)
    assert out.shape == (B, N, query_dim)
    # bf16 MXU operands + approx EUP reciprocal -> looser tolerance vs f32 ref.
    assert jnp.allclose(out, ref, atol=1e-2, rtol=2e-2), "mismatch vs reference"

    print("KERNEL_OK")
</pallas_src>

<mosaic_0001>
module attributes {stable_mosaic.version = 11 : i64} {
  func.func @_attn_head_kernel(%arg0: i32, %arg1: i32, %arg2: i32, %arg3: memref<1x16x32xbf16, #tpu.memory_space<vmem>>, %arg4: memref<1x8x48xbf16, #tpu.memory_space<vmem>>, %arg5: memref<1x32x16xbf16, #tpu.memory_space<vmem>>, %arg6: memref<1x48x16xbf16, #tpu.memory_space<vmem>>, %arg7: memref<1x48x16xbf16, #tpu.memory_space<vmem>>, %arg8: memref<1x16x32xbf16, #tpu.memory_space<vmem>>, %arg9: memref<1x16x32xf32, #tpu.memory_space<vmem>>, %arg10: memref<16x32xf32, #tpu.memory_space<vmem>>) attributes {dimension_semantics = [#tpu.dimension_semantics<parallel>, #tpu.dimension_semantics<parallel>, #tpu.dimension_semantics<arbitrary>], iteration_bounds = array<i64: 2, 1, 2>, scalar_prefetch = 0 : i64, scratch_operands = 1 : i64, tpu.core_type = #tpu.core_type<tc>, window_params = [{transform_indices = @transform_0, window_bounds = array<i64: 1, 16, 32>}, {transform_indices = @transform_1, window_bounds = array<i64: 1, 8, 48>}, {transform_indices = @transform_2, window_bounds = array<i64: 1, 32, 16>}, {transform_indices = @transform_3, window_bounds = array<i64: 1, 48, 16>}, {transform_indices = @transform_4, window_bounds = array<i64: 1, 48, 16>}, {transform_indices = @transform_5, window_bounds = array<i64: 1, 16, 32>}, {transform_indices = @transform_6, window_bounds = array<i64: 1, 16, 32>}]} {
    %c0_i32 = arith.constant 0 : i32
    %0 = arith.cmpi eq, %arg2, %c0_i32 : i32
    %1 = arith.extui %0 : i1 to i32
    %c0_i32_0 = arith.constant 0 : i32
    %2 = arith.cmpi ne, %1, %c0_i32_0 : i32
    scf.if %2 {
      %cst_30 = arith.constant 0.000000e+00 : f32
      %42 = vector.broadcast %cst_30 : f32 to vector<16x32xf32>
      %c0_31 = arith.constant 0 : index
      %c0_32 = arith.constant 0 : index
      %43 = vector.load %arg10[%c0_31, %c0_32] : memref<16x32xf32, #tpu.memory_space<vmem>>, vector<16x32xf32>
      tpu.vector_store %arg10[%c0_31, %c0_32], %42 {strides = array<i32>} : memref<16x32xf32, #tpu.memory_space<vmem>>, vector<16x32xf32>,
    } else {
    }
    %c0 = arith.constant 0 : index
    %c0_1 = arith.constant 0 : index
    %c0_2 = arith.constant 0 : index
    %3 = vector.load %arg3[%c0, %c0_1, %c0_2] : memref<1x16x32xbf16, #tpu.memory_space<vmem>>, vector<1x16x32xbf16>
    %4 = vector.shape_cast %3 : vector<1x16x32xbf16> to vector<16x32xbf16>
    %c0_3 = arith.constant 0 : index
    %c0_4 = arith.constant 0 : index
    %c0_5 = arith.constant 0 : index
    %5 = vector.load %arg4[%c0_3, %c0_4, %c0_5] : memref<1x8x48xbf16, #tpu.memory_space<vmem>>, vector<1x8x48xbf16>
    %6 = vector.shape_cast %5 : vector<1x8x48xbf16> to vector<8x48xbf16>
    %c0_6 = arith.constant 0 : index
    %c0_7 = arith.constant 0 : index
    %c0_8 = arith.constant 0 : index
    %7 = vector.load %arg5[%c0_6, %c0_7, %c0_8] : memref<1x32x16xbf16, #tpu.memory_space<vmem>>, vector<1x32x16xbf16>
    %8 = vector.shape_cast %7 : vector<1x32x16xbf16> to vector<32x16xbf16>
    %cst = arith.constant dense<0.000000e+00> : vector<16x16xf32>
    %9 = tpu.matmul %4, %8, %cst {dimension_numbers = #tpu.dot_dimension_numbers<[1], [0], [0], [1], [0, 0, 1, 1], [], []>} : vector<16x32xbf16>, vector<32x16xbf16>, vector<16x16xf32> -> vector<16x16xf32>
    %c0_9 = arith.constant 0 : index
    %c0_10 = arith.constant 0 : index
    %c0_11 = arith.constant 0 : index
    %10 = vector.load %arg6[%c0_9, %c0_10, %c0_11] : memref<1x48x16xbf16, #tpu.memory_space<vmem>>, vector<1x48x16xbf16>
    %11 = vector.shape_cast %10 : vector<1x48x16xbf16> to vector<48x16xbf16>
    %cst_12 = arith.constant dense<0.000000e+00> : vector<8x16xf32>
    %12 = tpu.matmul %6, %11, %cst_12 {dimension_numbers = #tpu.dot_dimension_numbers<[1], [0], [0], [1], [0, 0, 1, 1], [], []>} : vector<8x48xbf16>, vector<48x16xbf16>, vector<8x16xf32> -> vector<8x16xf32>
    %c0_13 = arith.constant 0 : index
    %c0_14 = arith.constant 0 : index
    %c0_15 = arith.constant 0 : index
    %13 = vector.load %arg7[%c0_13, %c0_14, %c0_15] : memref<1x48x16xbf16, #tpu.memory_space<vmem>>, vector<1x48x16xbf16>
    %14 = vector.shape_cast %13 : vector<1x48x16xbf16> to vector<48x16xbf16>
    %cst_16 = arith.constant dense<0.000000e+00> : vector<8x16xf32>
    %15 = tpu.matmul %6, %14, %cst_16 {dimension_numbers = #tpu.dot_dimension_numbers<[1], [0], [0], [1], [0, 0, 1, 1], [], []>} : vector<8x48xbf16>, vector<48x16xbf16>, vector<8x16xf32> -> vector<8x16xf32>
    %16 = arith.truncf %9 : vector<16x16xf32> to vector<16x16xbf16>
    %17 = arith.truncf %12 : vector<8x16xf32> to vector<8x16xbf16>
    %cst_17 = arith.constant dense<0.000000e+00> : vector<16x8xf32>
    %18 = tpu.matmul %16, %17, %cst_17 {dimension_numbers = #tpu.dot_dimension_numbers<[1], [1], [0], [0], [0, 0, 1, 0], [], []>} : vector<16x16xbf16>, vector<8x16xbf16>, vector<16x8xf32> -> vector<16x8xf32>
    %cst_18 = arith.constant dense<0xFF800000> : vector<16xf32>
    %19 = vector.multi_reduction <maximumf>, %18, %cst_18 [1] : vector<16x8xf32> to vector<16xf32>
    %20 = vector.shape_cast %19 : vector<16xf32> to vector<16x1xf32>
    %21 = vector.broadcast %20 : vector<16x1xf32> to vector<16x8xf32>
    %22 = arith.subf %18, %21 : vector<16x8xf32>
    %23 = math.exp %22 : vector<16x8xf32>
    %cst_19 = arith.constant dense<0.000000e+00> : vector<16xf32>
    %24 = vector.multi_reduction <add>, %23, %cst_19 [1] : vector<16x8xf32> to vector<16xf32>
    %25 = vector.shape_cast %24 : vector<16xf32> to vector<16x1xf32>
    %26 = arith.truncf %23 : vector<16x8xf32> to vector<16x8xbf16>
    %27 = arith.truncf %15 : vector<8x16xf32> to vector<8x16xbf16>
    %cst_20 = arith.constant dense<0.000000e+00> : vector<16x16xf32>
    %28 = tpu.matmul %26, %27, %cst_20 {dimension_numbers = #tpu.dot_dimension_numbers<[1], [0], [0], [1], [0, 0, 1, 1], [], []>} : vector<16x8xbf16>, vector<8x16xbf16>, vector<16x16xf32> -> vector<16x16xf32>
    %29 = tpu.reciprocal %25 {approx = true} : vector<16x1xf32> -> vector<16x1xf32>
    %30 = vector.broadcast %29 : vector<16x1xf32> to vector<16x16xf32>
    %31 = arith.mulf %28, %30 : vector<16x16xf32>
    %c0_21 = arith.constant 0 : index
    %c0_22 = arith.constant 0 : index
    %32 = vector.load %arg10[%c0_21, %c0_22] : memref<16x32xf32, #tpu.memory_space<vmem>>, vector<16x32xf32>
    %33 = arith.truncf %31 : vector<16x16xf32> to vector<16x16xbf16>
    %c0_23 = arith.constant 0 : index
    %c0_24 = arith.constant 0 : index
    %c0_25 = arith.constant 0 : index
    %34 = vector.load %arg8[%c0_23, %c0_24, %c0_25] : memref<1x16x32xbf16, #tpu.memory_space<vmem>>, vector<1x16x32xbf16>
    %35 = vector.shape_cast %34 : vector<1x16x32xbf16> to vector<16x32xbf16>
    %cst_26 = arith.constant dense<0.000000e+00> : vector<16x32xf32>
    %36 = tpu.matmul %33, %35, %cst_26 {dimension_numbers = #tpu.dot_dimension_numbers<[1], [0], [0], [1], [0, 0, 1, 1], [], []>} : vector<16x16xbf16>, vector<16x32xbf16>, vector<16x32xf32> -> vector<16x32xf32>
    %37 = arith.addf %32, %36 : vector<16x32xf32>
    %c0_27 = arith.constant 0 : index
    %c0_28 = arith.constant 0 : index
    %38 = vector.load %arg10[%c0_27, %c0_28] : memref<16x32xf32, #tpu.memory_space<vmem>>, vector<16x32xf32>
    tpu.vector_store %arg10[%c0_27, %c0_28], %37 {strides = array<i32>} : memref<16x32xf32, #tpu.memory_space<vmem>>, vector<16x32xf32>,
    %c1_i32 = arith.constant 1 : i32
    %39 = arith.cmpi eq, %arg2, %c1_i32 : i32
    %40 = arith.extui %39 : i1 to i32
    %c0_i32_29 = arith.constant 0 : i32
    %41 = arith.cmpi ne, %40, %c0_i32_29 : i32
    scf.if %41 {
      %c0_30 = arith.constant 0 : index
      %c0_31 = arith.constant 0 : index
      %42 = vector.load %arg10[%c0_30, %c0_31] : memref<16x32xf32, #tpu.memory_space<vmem>>, vector<16x32xf32>
      %c0_32 = arith.constant 0 : index
      %c0_33 = arith.constant 0 : index
      %c0_34 = arith.constant 0 : index
      %43 = vector.load %arg9[%c0_32, %c0_33, %c0_34] : memref<1x16x32xf32, #tpu.memory_space<vmem>>, vector<1x16x32xf32>
      %44 = vector.shape_cast %43 : vector<1x16x32xf32> to vector<16x32xf32>
      %45 = vector.shape_cast %42 : vector<16x32xf32> to vector<1x16x32xf32>
      tpu.vector_store %arg9[%c0_32, %c0_33, %c0_34], %45 {strides = array<i32>} : memref<1x16x32xf32, #tpu.memory_space<vmem>>, vector<1x16x32xf32>,
    } else {
    }
    return
  }
  func.func @transform_0(%arg0: i32, %arg1: i32, %arg2: i32) -> (i32, i32, i32) {
    %c0_i32 = arith.constant 0 : i32
    %c0_i32_0 = arith.constant 0 : i32
    return %arg0, %arg1, %c0_i32 : i32, i32, i32
  }
  func.func @transform_1(%arg0: i32, %arg1: i32, %arg2: i32) -> (i32, i32, i32) {
    %c0_i32 = arith.constant 0 : i32
    %c0_i32_0 = arith.constant 0 : i32
    %c0_i32_1 = arith.constant 0 : i32
    return %arg0, %c0_i32, %c0_i32_0 : i32, i32, i32
  }
  func.func @transform_2(%arg0: i32, %arg1: i32, %arg2: i32) -> (i32, i32, i32) {
    %c0_i32 = arith.constant 0 : i32
    %c0_i32_0 = arith.constant 0 : i32
    %c0_i32_1 = arith.constant 0 : i32
    return %arg2, %c0_i32, %c0_i32_0 : i32, i32, i32
  }
  func.func @transform_3(%arg0: i32, %arg1: i32, %arg2: i32) -> (i32, i32, i32) {
    %c0_i32 = arith.constant 0 : i32
    %c0_i32_0 = arith.constant 0 : i32
    %c0_i32_1 = arith.constant 0 : i32
    return %arg2, %c0_i32, %c0_i32_0 : i32, i32, i32
  }
  func.func @transform_4(%arg0: i32, %arg1: i32, %arg2: i32) -> (i32, i32, i32) {
    %c0_i32 = arith.constant 0 : i32
    %c0_i32_0 = arith.constant 0 : i32
    %c0_i32_1 = arith.constant 0 : i32
    return %arg2, %c0_i32, %c0_i32_0 : i32, i32, i32
  }
  func.func @transform_5(%arg0: i32, %arg1: i32, %arg2: i32) -> (i32, i32, i32) {
    %c0_i32 = arith.constant 0 : i32
    %c0_i32_0 = arith.constant 0 : i32
    %c0_i32_1 = arith.constant 0 : i32
    return %arg2, %c0_i32, %c0_i32_0 : i32, i32, i32
  }
  func.func @transform_6(%arg0: i32, %arg1: i32, %arg2: i32) -> (i32, i32, i32) {
    %c0_i32 = arith.constant 0 : i32
    %c0_i32_0 = arith.constant 0 : i32
    return %arg0, %arg1, %c0_i32 : i32, i32, i32
  }
}

</mosaic_0001>

<bundles_post_ra>
// kernel: tpu_custom_call.1
= control target key start
LH: loop header
LB: loop body
LE: loop exit
PB: predicated region body
PF: predicated region fallthrough
CT: control target
= control target key end

     0   :  { %11 = vsyncpa [#allocation4], 0  ;;  %s1475_s0 = inlined_call_operand.vmem [shape: bf16[2,16,32], index: 0, kind: input, shape index: {}]   ;;  %s1476_s1 = inlined_call_operand.vmem [shape: bf16[2,8,48], index: 1, kind: input, shape index: {}]   ;;  %s1477_s2 = inlined_call_operand.vmem [shape: bf16[2,32,16], index: 2, kind: input, shape index: {}]   ;;  %s1478_s3 = inlined_call_operand.vmem [shape: bf16[2,48,16], index: 3, kind: input, shape index: {}]   ;;  %s1479_s4 = inlined_call_operand.vmem [shape: bf16[2,48,16], index: 4, kind: input, shape index: {}]   ;;  %s1480_s5 = inlined_call_operand.vmem [shape: bf16[2,16,32], index: 5, kind: input, shape index: {}]   ;;  %s1481_s6 = inlined_call_operand.hbm [shape: f32[2,16,32], index: 6, kind: output, shape index: {}]  }
   0x1   :  { %13 = vsyncpa [#allocation4 + $0x1], 0  ;;  %s1280_s21 = smov 0   ;;  %s1282_s22 = smov 0  }
   0x2   :  { %s1284_s23 = smov 0   ;;  %s1286_s24 = smov 0  }
   0x3   :  { %s1288_s25 = smov 0   ;;  %s1290_s26 = smov 0  }
   0x4   :  { %s1292_s27 = smov 0   ;;  %s1294_s28 = smov 0  }
   0x5 LB: > { %1491 = sst [smem:[#allocation6_spill]] %s1209_s21  ;;  %s945_s29 = sadd.s32 4294967295, %s1237_s28   ;;  %s1237_s28 = sphi %s1294_s28, %s19_s28   ;;  %s1233_s27 = sphi %s1292_s27, %s1511_s27   ;;  %s1229_s26 = sphi %s1290_s26, %s1514_s26   ;;  %s1225_s25 = sphi %s1288_s25, %s1509_s25   ;;  %s1221_s24 = sphi %s1286_s24, %s1508_s24   ;;  %s1217_s23 = sphi %s1284_s23, %s1507_s23   ;;  %s1213_s22 = sphi %s1282_s22, %s1513_s22   ;;  %s1209_s21 = sphi %s1280_s21, %s1512_s21  }
   0x6   : > { %1492 = sst [smem:[#allocation7_spill]] %s1217_s23  ;;  %s946_s30 = sadd.s32 4294967294, %s1237_s28  }
   0x7   : > { %1493 = sst [smem:[#allocation8_spill]] %s1229_s26  ;;  %s31_s7 = sadd.s32 1, %s1229_s26 }
   0x8   : > { %1494 = sst [smem:[#allocation9_spill]] %s1233_s27  ;;  %p32_p0 = scmp.ge.s32.totalorder %s31_s7, 2 }
   0x9   : > { %1495 = sst [smem:[#allocation10_spill]] %s1237_s28  ;;  %s38_s8 = sadd.s32 1, %s1233_s27 }
   0xa   : > { %p215_p1 = scmp.ne.s32.totalorder %s1217_s23, %s1213_s22  ;;  %p216_p2 = scmp.eq.s32.totalorder %s945_s29, 3 }
   0xb   : > { %s1516_s7 = smov (%p32_p0, %s31_s7), 0  ;;  %s1518_s8 = smov (!%p32_p0, %s38_s8), %s1233_s27 }
   0xc   : > { %1496 = sst [smem:[#allocation11_spill]] %s1516_s7  ;;  %p1329_p3 = por %p216_p2, %p215_p1 }
   0xd   : > { %p221_p4 = scmp.ne.s32.totalorder %s1213_s22, %s1209_s21  ;;  %p40_p5 = scmp.ge.s32.totalorder %s1518_s8, 2 }
   0xe   : > { %p222_p6 = scmp.eq.s32.totalorder %s946_s30, 3  ;;  %p949_p7 = scmp.ge.s32.totalorder %s1237_s28, 1 }
   0xf   : > { %p292_p8 = scmp.lt.s32.totalorder %s1237_s28, 5  ;;  %s1520_s8 = smov (%p40_p5, %s1518_s8), 0 }
  0x10   : > { %1498 = sst [smem:[#allocation12_spill]] %s1520_s8  ;;  %p1339_p9 = por %p222_p6, %p221_p4 }
  0x11   : > { %p293_p10 = pnand %p949_p7, %p292_p8  ;;  %s200_s11 = ssub.s32 %s1233_s27, %s1520_s8 }
  0x12   : > { %s1499_s10 = scalar_select %p1339_p9, 1, 0 }
  0x13   : > { %s205_s12 = sadd.s32 1, %s1217_s23  ;;  %p203_p11 = scmp.eq.s32.totalorder %s200_s11, 0 }
  0x14   : > { %1500 = sst [smem:[#allocation13_spill]] %s1499_s10  ;;  %296 = sbr.rel (%p293_p10) target bundleno = 1047 (0x417), region = 44 }
  0x15   : > { %s1347_s13 = scalar_select %p203_p11, %s1217_s23, %s205_s12  }
  0x16   : > { %s1485_s14 = sand.u32 (!%p293_p10), 1, %s1213_s22   ;;  %p351_p12 = scmp.lt.s32.totalorder (!%p293_p10), %s1225_s25, 1 }
  0x17   : > { %1501 = sst [smem:[#allocation14_spill]] %s1347_s13  ;;  %s950_s15 = sshll.u32 (!%p293_p10), %s1485_s14, 4 }
  0x18   : > { %p364_p13 = scmp.lt.s32.totalorder (!%p293_p10), %s1221_s24, 1  ;;  %s1382_s12 = scalar_lea.vmem (!%p293_p10), [#allocation3], %s950_s15 }
  0x19   : > { %s352_s16 = scalar_select %p351_p12, %s1225_s25, 1 }
  0x1a   : > { %s365_s17 = scalar_select %p364_p13, %s1221_s24, 1 }
  0x1b   : > { %s983_s18 = sshll.u32 %s352_s16, 3  ;;  %s953_s19 = sshll.u32 %s352_s16, 2 }
  0x1c   : > { %s1359_s30 = scalar_lea.vmem %s1475_s0, %s983_s18  ;;  %s1364_s8 = scalar_lea.vmem %s1476_s1, %s953_s19 }
  0x1d   : > { %s984_s7 = sshll.u32 %s365_s17, 4  ;;  %s1050_s27 = smul.u32 24, %s365_s17 }
  0x1e   : > { %s368_s14 = scalar_lea.vmem %s1477_s2, %s984_s7  ;;  %s985_s23 = sshll.u32 %s365_s17, 3 }
  0x1f   : > { %s373_s16 = scalar_lea.vmem %s1478_s3, %s1050_s27  ;;  %s1375_s18 = scalar_lea.vmem %s1479_s4, %s1050_s27 }
  0x20   : > { %s1380_s19 = scalar_lea.vmem %s1480_s5, %s985_s23  ;;  %p960_p0 = scmp.ne.s32.totalorder %s1221_s24, 0 }
  0x22   : > { %389 = sbr.rel (%p960_p0) target bundleno = 41 (0x29), region = 48 }
  0x27   : > { %vm390_vm0 = vcmask 261120   ;;  %v1239_v0 = vmov 0.0  }
  0x28   : > { %391 = vst.msk [vmem:[#allocation2] sm:$0xff] %vm390_vm0, %v1239_v0  ;;  %392 = vst.msk [vmem:[#allocation2 + $0x8] sm:$0xff] %vm390_vm0, %v1239_v0 }
  0x29 PF: > { %v1127_v1 = vld [vmem:[%s373_s16 + $0x10] sm:$0xff]   ;;  %v1240_v2 = vmov 0.0   ;;  %v1128_v3 = vld [vmem:[%s368_s14 + $0x8] sm:$0xff]   ;;  %vm1241_vm1 = vmmov 0   ;;  %v1130_v5 = vld [vmem:[%s368_s14] sm:$0xff]   ;;  %vm417_vm2 = vcmask 261120  }
  0x2a   : > { %1012 = vmatprep.subr.bf16.mxu1 %v1240_v2  ;;  %1004 = vmatprep.subr.bf16.mxu0 %v1240_v2  ;;  %v1129_v4 = vld [vmem:[%s373_s16 + $0x8] sm:$0xff]   ;;  %v1131_v6 = vld [vmem:[%s373_s16] sm:$0xff]   ;;  %vm486_vm3 = vcmask 392192   ;;  %v1133_v9 = vld [vmem:[%s1375_s18 + $0x10] sm:$0xff]   ;;  %vm596_vm4 = vcmask 130048   ;;  %vm644_vm5 = vcmask 64512  }
  0x2b   : > { %1013 = vmatpush3.bf16.msra.mxu1 %v1127_v1  ;;  %1008 = vmatprep.mubr.msk.bf16.mxu0 %vm1241_vm1, %v1240_v2  ;;  %v1132_v7 = vld [vmem:[%s1359_s30] sm:$0xff]   ;;  %v1134_v10 = vld [vmem:[%s1375_s18 + $0x8] sm:$0xff]   ;;  %vm668_vm6 = vcmask 1043456   ;;  %p977_p1 = scmp.ne.s32.totalorder %s1221_s24, 1 }
  0x2c   : > { %1005 = vmatpush3.bf16.msra.mxu0 %v1128_v3  ;;  %1014 = vmatprep.subr.bf16.mxu1 %v1240_v2  ;;  %v395_v8 = vld [vmem:[%s1364_s8] sm:$0xf] }
  0x2d   : > { %1006 = vmatprep.subr.bf16.mxu0 %v1240_v2  ;;  %1018 = vmatprep.mubr.msk.bf16.mxu1 %vm1241_vm1, %v1240_v2  ;;  %v1135_v11 = vld [vmem:[%s1375_s18] sm:$0xff]  }
  0x2e   : > { %v1136_v46 = vld [vmem:[%s1380_s19] sm:$0xff]  }
  0x2f   : > { %1015 = vmatpush3.bf16.msra.mxu1 %v1129_v4  ;;  %v717_v58 = vld [vmem:[#allocation2] sm:$0xff]  ;;  %v718_v62 = vld [vmem:[#allocation2 + $0x8] sm:$0xff] }
  0x30   : > { %1007 = vmatpush3.bf16.msra.mxu0 %v1130_v5  ;;  %1016 = vmatprep.subr.bf16.mxu1 %v1240_v2 }
  0x31   : > { %1022 = vmatprep.subr.bf16.mxu0 %v1240_v2 }
  0x33   : > { %1017 = vmatpush3.bf16.msra.mxu1 %v1131_v6  ;;  %1009 = vmatmul.mubr.msk.bf16.vlgmr.msra.gmra.mxu0 %vm417_vm2, %v1132_v7 }
  0x34   : > { %1032 = vmatprep.subr.bf16.mxu1 %v1240_v2  ;;  %1028 = vmatprep.mubr.msk.bf16.mxu0 %vm1241_vm1, %v1240_v2 }
  0x35   : > { %1023 = vmatpush3.bf16.msra.mxu0 %v1133_v9 }
  0x36   : > { %1019 = vmatmul.mubr.msk.bf16.vlgmr.msra.gmra.mxu1 %vm486_vm3, %v395_v8  ;;  %1024 = vmatprep.subr.bf16.mxu0 %v1240_v2 }
  0x37   : > { %1034 = vmatprep.mubr.msk.bf16.mxu1 %vm1241_vm1, %v1240_v2 }
  0x39   : > { %1025 = vmatpush3.bf16.msra.mxu0 %v1134_v10 }
  0x3a   : > { %1026 = vmatprep.subr.bf16.mxu0 %v1240_v2 }
  0x3d   : > { %1027 = vmatpush3.bf16.msra.mxu0 %v1135_v11 }
  0x3e   : > { %1038 = vmatprep.subr.bf16.mxu0 %v1240_v2 }
  0x40   : > { %1029 = vmatmul.mubr.msk.bf16.vlgmr.msra.gmra.mxu0 %vm486_vm3, %v395_v8 }
  0x41   : > { %1040 = vmatprep.mubr.msk.bf16.mxu0 %vm1241_vm1, %v1240_v2 }
  0xf3   : > { %v455_v12 = vpop.f32.mrf.mxu0 }
  0xf5   : > { %v1010_v13 = vpop.f32.mrf.mxu0 }
  0xf6   : > { %v524_v14 = vpop.f32.mrf.mxu1 }
  0xf7   : > { %v595_v15 = vpack.c.bf16 %v524_v14, %v524_v14  ;;  %v458_v16 = vpop.f32.mrf.mxu0 }
  0xf8   : > { %v1020_v17 = vpop.f32.mrf.mxu1  ;;  %v594_v22 = vpack.c.bf16 %v458_v16, %v455_v12 }
  0xf9   : > { %v601_v18 = vsel %vm596_vm4, %v595_v15, 0  ;;  %v1011_v19 = vpop.f32.mrf.mxu0 }
  0xfa   : > { %v527_v20 = vpop.f32.mrf.mxu1  ;;  %1033 = vmatpush3.bf16.xpose.msra.mxu1 %v601_v18 }
  0xfb   : > { %1044 = vmatprep.subr.bf16.mxu1 %v1240_v2 }
  0xfc   : > { %v1021_v21 = vpop.f32.mrf.mxu1 }
 0x100   : > { %v588_v29 = vpop.f32.mrf.mxu0 }
 0x101   : > { %1035 = vmatmul.mubr.msk.bf16.vlgmr.msra.gmra.mxu1 %vm596_vm4, %v594_v22  ;;  %v664_v30 = vpack.c.bf16 %v588_v29, %v588_v29 }
 0x102   : > { %1046 = vmatprep.mubr.msk.bf16.mxu1 %vm1241_vm1, %v1240_v2  ;;  %v1030_v31 = vpop.f32.mrf.mxu0  ;;  %1045 = vmatpush3.bf16.msra.mxu1 %v1136_v46 }
 0x103   : > { %v670_v32 = vsel %vm668_vm6, %v664_v30, 0 }
 0x104   : > { %v591_v33 = vpop.f32.mrf.mxu0  ;;  %1039 = vmatpush3.bf16.msra.mxu0 %v670_v32 }
 0x106   : > { %v1031_v34 = vpop.f32.mrf.mxu0 }
 0x1c1   : > { %v637_v23 = vpop.f32.mrf.mxu1 }
 0x1c2   : > { %v645_v24 = vsel %vm644_vm5, %v637_v23, -inf }
 0x1c3   : > { %646 = vmax.xlane.f32.xlu0 %v645_v24  ;;  %v1036_v25 = vpop.f32.mrf.mxu1 }
 0x1c5   : > { %v640_v26 = vpop.f32.mrf.mxu1 }
 0x1c6   : > { %v648_v27 = vsel %vm644_vm5, %v640_v26, -inf }
 0x1c7   : > { %649 = vmax.xlane.f32.xlu0 %v648_v27  ;;  %v1037_v28 = vpop.f32.mrf.mxu1 }
 0x24c   : > { %v647_v35 = vpop.xlane.xlu0 %646 }
 0x24d   : > { %v651_v36 = vsub.f32 %v637_v23, %v647_v35 }
 0x24f   : > { %v653_v37 = vmul.f32 1.442695, %v651_v36 }
 0x250   : > { %v650_v38 = vpop.xlane.xlu0 %649 }
 0x251   : > { %1137 = vpow2.f32 %v653_v37  ;;  %v652_v39 = vsub.f32 %v640_v26, %v650_v38 }
 0x253   : > { %v655_v40 = vmul.f32 1.442695, %v652_v39 }
 0x255   : > { %1139 = vpow2.f32 %v655_v40 }
 0x25e   : > { %v1138_v41 = vpop.eup %1137 }
 0x25f   : > { %v657_v42 = vsel %vm644_vm5, %v1138_v41, 0.0 }
 0x260   : > { %658 = vadd.xlane.f32.xlu1 %v657_v42 }
 0x262   : > { %v1140_v43 = vpop.eup %1139 }
 0x263   : > { %v660_v44 = vsel %vm644_vm5, %v1140_v43, 0.0  ;;  %v663_v45 = vpack.c.bf16 %v1140_v43, %v1138_v41 }
 0x264   : > { %661 = vadd.xlane.f32.xlu1 %v660_v44 }
 0x265   : > { %1041 = vmatmul.mubr.msk.bf16.vlgmr.msra.gmra.mxu0 %vm644_vm5, %v663_v45 }
 0x2e9   : > { %v659_v47 = vpop.xlane.xlu1 %658 }
 0x2ea   : > { %1141 = vrcp.f32 %v659_v47 }
 0x2ed   : > { %v662_v48 = vpop.xlane.xlu1 %661 }
 0x2ee   : > { %1143 = vrcp.f32 %v662_v48 }
 0x2f7   : > { %v1142_v51 = vpop.eup %1141 }
 0x2fb   : > { %v1144_v52 = vpop.eup %1143 }
 0x325   : > { %v706_v49 = vpop.f32.mrf.mxu0 }
 0x326   : > { %v715_v54 = vmul.f32 %v1142_v51, %v706_v49 }
 0x327   : > { %v1042_v50 = vpop.f32.mrf.mxu0 }
 0x329   : > { %v709_v53 = vpop.f32.mrf.mxu0 }
 0x32a   : > { %v716_v55 = vmul.f32 %v1144_v52, %v709_v53 }
 0x32b   : > { %v1043_v56 = vpop.f32.mrf.mxu0 }
 0x32c   : > { %v719_v57 = vpack.c.bf16 %v716_v55, %v715_v54 }
 0x32e   : > { %1047 = vmatmul.mubr.msk.bf16.vlgmr.msra.gmra.mxu1 %vm596_vm4, %v719_v57 }
 0x3ee   : > { %v765_v59 = vpop.f32.mrf.mxu1 }
 0x3ef   : > { %v772_v60 = vadd.f32 %v765_v59, %v717_v58 }
 0x3f0   : > { %v1048_v61 = vpop.f32.mrf.mxu1 }
 0x3f1   : > { %774 = vst.msk [vmem:[#allocation2] sm:$0xff] %vm417_vm2, %v772_v60  ;;  %779 = sbr.rel (%p977_p1) target bundleno = 1022 (0x3fe), region = 52 }
 0x3f2   : > { %v768_v63 = vpop.f32.mrf.mxu1 }
 0x3f3   : > { %v773_v0 = vadd.f32 %v768_v63, %v718_v62 }
 0x3f4   : > { %v1049_v1 = vpop.f32.mrf.mxu1 }
 0x3f5   : > { %775 = vst.msk [vmem:[#allocation2 + $0x8] sm:$0xff] %vm417_vm2, %v773_v0 }
 0x3f8   : > { %v780_v2 = vld [vmem:[#allocation2] sm:$0xff] }
 0x3f9   : > { %782 = vst.msk [vmem:[%s1382_s12] sm:$0xff] %vm417_vm2, %v780_v2 }
 0x3fc   : > { %v781_v3 = vld [vmem:[#allocation2 + $0x8] sm:$0xff] }
 0x3fd   : > { %783 = vst.msk [vmem:[%s1382_s12 + $0x8] sm:$0xff] %vm417_vm2, %v781_v3 }
 0x3fe PF: > { %s986_s21 = sshll.u32 %s1225_s25, 8  ;;  %s800_s24 = sshll.u32 %s1382_s12, 4  ;;  %s1420_s24 = int_to_ptr.vmem [resolvable:$true] %s800_s24 }
 0x3ff   : > { %s1417_s27 = scalar_lea.hbm %s1481_s6, %s986_s21  ;;  %s1502_s28 = sand.u32 1, %s1213_s22  }
 0x400   : > { %s1424_s7 = scalar_lea.sflag [#allocation4], %s1502_s28  ;;  %s1145_s8 = scalar_lea.vmem %s1420_s24, 256 }
 0x401   : > { %p1146_p2 = scmp.ne.s32.totalorder %s1420_s24, %s1145_s8  ;;  %s1242_s25 = smov [#allocation3]  }
 0x402   : > { %s1149_s10 = sshll.u32 %s1242_s25, 4  ;;  %s1150_s10 = int_to_ptr.vmem [resolvable:$false] %s1149_s10 }
 0x403   : > { %p1147_p4 = pnand %p1146_p2, %p1329_p3  ;;  %s1151_s13 = scalar_lea.vmem %s1150_s10, 512 }
 0x404   : > { %p1152_p6 = scmp.lt.s32.totalorder %s1420_s24, %s1150_s10  ;;  %p1153_p7 = scmp.lt.s32.totalorder %s1151_s13, %s1145_s8 }
 0x405   : > { %p1148_p5 = pneg %p1147_p4 }
 0x406   : > { %p1154_p8 = por %p1153_p7, %p1152_p6 }
 0x408   : > { %p1155_p10 = pnand %p1154_p8, %p1148_p5 }
 0x40a   : > { %1158 = shalt.err (!%p1155_p10)
}
 0x40b   : > { %s1159_s14 = scalar_lea.hbm %s1417_s27, 256  ;;  %s1163_s30 = scalar_lea.hbm %s1481_s6, 512 }
 0x40c   : > { %p1160_p11 = scmp.ne.s32.totalorder %s1417_s27, %s1159_s14  ;;  %p1164_p0 = scmp.lt.s32.totalorder %s1417_s27, %s1481_s6 }
 0x40d   : > { %p1165_p1 = scmp.lt.s32.totalorder %s1163_s30, %s1159_s14 }
 0x40e   : > { %p1161_p12 = pnand %p1160_p11, %p1329_p3 }
 0x40f   : > { %p1166_p2 = por %p1165_p1, %p1164_p0 }
 0x410   : > { %p1162_p13 = pneg %p1161_p12 }
 0x412   : > { %p1167_p4 = pnand %p1166_p2, %p1162_p13 }
 0x414   : > { %1170 = shalt.err (!%p1167_p4)
}
 0x415   : > { %s1243_s18 = smov 128   ;;  %s1244_s29 = smov 8  }
 0x416   : > { %1051 = dma.vmem_to_hbm [thread:$0]  (%p1329_p3), %s1420_s24, 256, %s1417_s27, %s1424_s7, %s1243_s18, %s1243_s18, %s1244_s29  }
 0x417 PF: > { %s1503_s11 = sld [smem:[#allocation10_spill]] }
 0x418   : > { %s1504_s19 = sld [smem:[#allocation6_spill]] }
 0x41d   : > { %p1057_p5 = scmp.ge.s32.totalorder %s1503_s11, 2 }
 0x41e   : > { %s815_s21 = sand.u32 1, %s1504_s19  }
 0x41f   : > { %p1054_p6 = pnand %p1057_p5, %p1339_p9  ;;  %s816_s23 = scalar_lea.sflag [#allocation4], %s815_s21 }
 0x421   : > { %p1055_p7 = pneg %p1054_p6 }
 0x423   : > { %1204 = dma.done.wait (%p1055_p7), %s816_s23, 256  }
 0x424   : > { %1206 = vsyncadd (%p1055_p7), %s816_s23, 4294967040  ;;  %s19_s28 = sadd.s32 1, %s1503_s11   ;;  %s1506_s26 = sld [smem:[#allocation7_spill]] }
 0x425   : > { %p16_p8 = scmp.ge.s32.totalorder %s19_s28, 6   ;;  %s1507_s23 = sld [smem:[#allocation14_spill]] }
 0x426   : > { %s1508_s24 = sld [smem:[#allocation8_spill]]  ;;  %s1512_s21 = smov %s1213_s22 }
 0x427   : > { %s1509_s25 = sld [smem:[#allocation9_spill]] }
 0x428   : > { %s1510_s9 = sld [smem:[#allocation11_spill]] }
 0x429   : > { %s1511_s27 = sld [smem:[#allocation12_spill]] }
 0x42a   : > { %s1513_s22 = smov %s1506_s26  ;;  %18 = sbr.rel (!%p16_p8) target bundleno = 5 (0x5), region = 102 }
 0x42e   : > { %s1514_s26 = smov %s1510_s9 }
 0x42f   :  { %821 = vsyncpa [#allocation4], 1 }
 0x430   :  { %823 = vsyncpa [#allocation4 + $0x1], 1 }

</bundles_post_ra>
